<compile_context>
chip_gen: v5e
topology: v5e:2x2
jax: 0.10.0
libtpu: 0.0.40
codegen_flags: <defaults>
</compile_context>

<pallas_src>
import functools

import jax
import jax.numpy as jnp
from jax.experimental import pallas as pl
from jax.experimental.pallas import tpu as pltpu


_LANE = 128            # TPU lane width (last dim)
_SUB = 16              # sublane rounding; covers bf16 packing (16 rows / vreg)
_NEG_INF_BIAS = -1e30  # kills padded logit columns under the softmax


def _round_up(n, m):
    return ((n + m - 1) // m) * m


def _discriminator_kernel(x_ref, w1_ref, b1_ref, w2_ref, b2_ref,
                          w3_ref, b3_ref, o_ref):
    """Fused 3-layer MLP + log-softmax on one batch tile.

    Matmul operands are bf16 (MXU fast path, f32 accumulation via
    preferred_element_type); bias add / ReLU / log-softmax run in f32.
    All weights are fully resident in VMEM for every grid step.
    """
    x = x_ref[...]  # bf16 (bt, in_dims)

    # Linear 1 + ReLU
    h1 = jnp.dot(x, w1_ref[...], preferred_element_type=jnp.float32) + b1_ref[...]
    h1 = jnp.maximum(h1, 0.0)

    # Linear 2 + ReLU
    h2 = jnp.dot(h1.astype(jnp.bfloat16), w2_ref[...],
                 preferred_element_type=jnp.float32) + b2_ref[...]
    h2 = jnp.maximum(h2, 0.0)

    # Linear 3 (logits).  Feature dim is lane-padded to a multiple of 128;
    # padded bias columns are -1e30 so exp(pad - max) underflows to 0 and the
    # log-softmax over the padded axis equals the unpadded result exactly.
    logits = jnp.dot(h2.astype(jnp.bfloat16), w3_ref[...],
                     preferred_element_type=jnp.float32) + b3_ref[...]

    # Numerically stable log-softmax over the (padded) feature axis.
    m = jnp.max(logits, axis=-1, keepdims=True)
    shifted = logits - m
    lse = jnp.log(jnp.sum(jnp.exp(shifted), axis=-1, keepdims=True))
    o_ref[...] = (shifted - lse).astype(o_ref.dtype)


@functools.partial(jax.jit, static_argnames=("batch_tile",))
def discriminator_forward(x, w1, b1, w2, b2, w3, b3, *, batch_tile=256):
    """Discriminator forward pass via a single fused Pallas kernel.

    x:  (B, input_dims)         float32
    wk: (in_k, out_k)           float32 (transposed vs. PyTorch's (out, in))
    bk: (1, out_k)              float32
    returns: (B, output_dims)   float32 log-probabilities
    """
    B, in_dims = x.shape
    hid = w1.shape[1]
    out_dims = w3.shape[1]

    # ---- choose the batch tile --------------------------------------------
    bt = min(batch_tile, _round_up(B, _SUB))
    if B > _SUB:
        # Keep >= 2 grid steps so v7x's second TensorCore gets work.
        bt = min(bt, _round_up(pl.cdiv(B, 2), _SUB))
    bt = max(bt, _SUB)
    Bp = _round_up(B, bt)
    grid = (Bp // bt,)

    # ---- bf16 matmul operands, TPU-friendly padding -------------------------
    x_bf = x.astype(jnp.bfloat16)
    if Bp != B:
        x_bf = jnp.pad(x_bf, ((0, Bp - B), (0, 0)))

    out_pad = _round_up(max(out_dims, _LANE), _LANE)
    w3p, b3p = w3, b3
    if out_pad != out_dims:
        w3p = jnp.pad(w3, ((0, 0), (0, out_pad - out_dims)))
        b3p = jnp.pad(b3, ((0, 0), (0, out_pad - out_dims)),
                      constant_values=_NEG_INF_BIAS)

    w1b = w1.astype(jnp.bfloat16)
    w2b = w2.astype(jnp.bfloat16)
    w3b = w3p.astype(jnp.bfloat16)

    # Weights/biases are tiny -> keep the full arrays resident every step.
    # (If hidden_dims ever grows large, note each constant spec is still
    #  double-buffered by Pallas; single-buffer via pipeline_mode=pl.Buffered(1)
    #  or raise vmem_limit_bytes before hitting v7x's 64 MiB VMEM.)
    full = lambda shape: pl.BlockSpec(shape, lambda i: (0, 0))

    flops = 2 * Bp * (in_dims * hid + hid * hid + hid * out_pad)
    bytes_accessed = (x_bf.size * 2
                      + (w1b.size + w2b.size + w3b.size) * 2
                      + (b1.size + b2.size + b3p.size) * 4
                      + Bp * out_pad * 4)
    cost = pl.CostEstimate(flops=flops,
                           transcendentals=Bp * (out_pad + 1),
                           bytes_accessed=bytes_accessed)

    out = pl.pallas_call(
        _discriminator_kernel,
        out_shape=jax.ShapeDtypeStruct((Bp, out_pad), jnp.float32),
        grid_spec=pltpu.PrefetchScalarGridSpec(
            num_scalar_prefetch=0,
            grid=grid,
            in_specs=[
                pl.BlockSpec((bt, in_dims), lambda i: (i, 0)),  # x tile (bf16)
                full((in_dims, hid)),     # W1 (bf16)
                full((1, hid)),           # b1 (f32)
                full((hid, hid)),         # W2 (bf16)
                full((1, hid)),           # b2 (f32)
                full((hid, out_pad)),     # W3 (bf16, lane-padded)
                full((1, out_pad)),       # b3 (f32, pad columns = -1e30)
            ],
            out_specs=pl.BlockSpec((bt, out_pad), lambda i: (i, 0)),
        ),
        compiler_params=pltpu.CompilerParams(
            dimension_semantics=("parallel",)),
        cost_estimate=cost,
    )(x_bf, w1b, b1, w2b, b2, w3b, b3p)

    return out[:B, :out_dims]


def init_discriminator_params(key, input_dims, hidden_dims, output_dims):
    """nn.Linear-style init (U[-1/sqrt(fan_in), 1/sqrt(fan_in)]).

    Weights returned as (in_features, out_features) so x @ W + b matches
    PyTorch's x @ W_torch.T + b.
    """
    ks = jax.random.split(key, 6)

    def linear(kw, kb, fan_in, fan_out):
        bound = 1.0 / jnp.sqrt(jnp.float32(fan_in))
        w = jax.random.uniform(kw, (fan_in, fan_out), jnp.float32, -bound, bound)
        b = jax.random.uniform(kb, (1, fan_out), jnp.float32, -bound, bound)
        return w, b

    w1, b1 = linear(ks[0], ks[1], input_dims, hidden_dims)
    w2, b2 = linear(ks[2], ks[3], hidden_dims, hidden_dims)
    w3, b3 = linear(ks[4], ks[5], hidden_dims, output_dims)
    return w1, b1, w2, b2, w3, b3


def _reference_forward_f32(x, w1, b1, w2, b2, w3, b3):
    h1 = jnp.maximum(x @ w1 + b1, 0.0)
    h2 = jnp.maximum(h1 @ w2 + b2, 0.0)
    logits = h2 @ w3 + b3
    return jax.nn.log_softmax(logits, axis=-1)


def _reference_forward_bf16(x, w1, b1, w2, b2, w3, b3):
    """Same mixed-precision recipe as the kernel (bf16 matmuls, f32 elsewhere)."""
    bf = jnp.bfloat16
    h1 = jnp.dot(x.astype(bf), w1.astype(bf),
                 preferred_element_type=jnp.float32) + b1
    h1 = jnp.maximum(h1, 0.0)
    h2 = jnp.dot(h1.astype(bf), w2.astype(bf),
                 preferred_element_type=jnp.float32) + b2
    h2 = jnp.maximum(h2, 0.0)
    logits = jnp.dot(h2.astype(bf), w3.astype(bf),
                     preferred_element_type=jnp.float32) + b3
    return jax.nn.log_softmax(logits, axis=-1)


if __name__ == "__main__":
    # batch=512 so the default batch_tile=256 yields a 2-step "parallel" grid
    # (both v7x TensorCores busy); input/hidden=32, output=2 (binary domain
    # discriminator).
    B, INPUT_DIMS, HIDDEN_DIMS, OUTPUT_DIMS = 512, 32, 32, 2

    key = jax.random.PRNGKey(0)
    kx, kp = jax.random.split(key)
    x = jax.random.normal(kx, (B, INPUT_DIMS), jnp.float32)
    params = init_discriminator_params(kp, INPUT_DIMS, HIDDEN_DIMS, OUTPUT_DIMS)

    out = discriminator_forward(x, *params)
    out = jax.block_until_ready(out)
    assert out.shape == (B, OUTPUT_DIMS)

    ref_bf16 = _reference_forward_bf16(x, *params)   # exact precision recipe
    ref_f32 = _reference_forward_f32(x, *params)     # module-level sanity check
    assert jnp.allclose(out, ref_bf16, atol=1e-3, rtol=1e-3), \
        "mismatch vs mixed-precision JAX reference"
    assert jnp.allclose(out, ref_f32, atol=6e-2), \
        "mismatch vs f32 JAX reference"

    print("KERNEL_OK")
</pallas_src>

<mosaic_0001>
module attributes {stable_mosaic.version = 11 : i64} {
  func.func @_discriminator_kernel(%arg0: i32, %arg1: memref<256x32xbf16, #tpu.memory_space<vmem>>, %arg2: memref<32x32xbf16, #tpu.memory_space<vmem>>, %arg3: memref<1x32xf32, #tpu.memory_space<vmem>>, %arg4: memref<32x32xbf16, #tpu.memory_space<vmem>>, %arg5: memref<1x32xf32, #tpu.memory_space<vmem>>, %arg6: memref<32x128xbf16, #tpu.memory_space<vmem>>, %arg7: memref<1x128xf32, #tpu.memory_space<vmem>>, %arg8: memref<256x128xf32, #tpu.memory_space<vmem>>) attributes {dimension_semantics = [#tpu.dimension_semantics<parallel>], iteration_bounds = array<i64: 2>, scalar_prefetch = 0 : i64, scratch_operands = 0 : i64, tpu.core_type = #tpu.core_type<tc>, window_params = [{transform_indices = @transform_0, window_bounds = array<i64: 256, 32>}, {pipeline_mode = #tpu.pipeline_mode<synchronous>, transform_indices = @transform_1, window_bounds = array<i64: 32, 32>}, {pipeline_mode = #tpu.pipeline_mode<synchronous>, transform_indices = @transform_2, window_bounds = array<i64: 1, 32>}, {pipeline_mode = #tpu.pipeline_mode<synchronous>, transform_indices = @transform_3, window_bounds = array<i64: 32, 32>}, {pipeline_mode = #tpu.pipeline_mode<synchronous>, transform_indices = @transform_4, window_bounds = array<i64: 1, 32>}, {pipeline_mode = #tpu.pipeline_mode<synchronous>, transform_indices = @transform_5, window_bounds = array<i64: 32, 128>}, {pipeline_mode = #tpu.pipeline_mode<synchronous>, transform_indices = @transform_6, window_bounds = array<i64: 1, 128>}, {transform_indices = @transform_7, window_bounds = array<i64: 256, 128>}]} {
    %c0 = arith.constant 0 : index
    %c0_0 = arith.constant 0 : index
    %0 = vector.load %arg1[%c0, %c0_0] : memref<256x32xbf16, #tpu.memory_space<vmem>>, vector<256x32xbf16>
    %c0_1 = arith.constant 0 : index
    %c0_2 = arith.constant 0 : index
    %1 = vector.load %arg2[%c0_1, %c0_2] : memref<32x32xbf16, #tpu.memory_space<vmem>>, vector<32x32xbf16>
    %cst = arith.constant dense<0.000000e+00> : vector<256x32xf32>
    %2 = tpu.matmul %0, %1, %cst {dimension_numbers = #tpu.dot_dimension_numbers<[1], [0], [0], [1], [0, 0, 1, 1], [], []>} : vector<256x32xbf16>, vector<32x32xbf16>, vector<256x32xf32> -> vector<256x32xf32>
    %c0_3 = arith.constant 0 : index
    %c0_4 = arith.constant 0 : index
    %3 = vector.load %arg3[%c0_3, %c0_4] : memref<1x32xf32, #tpu.memory_space<vmem>>, vector<1x32xf32>
    %4 = vector.broadcast %3 : vector<1x32xf32> to vector<256x32xf32>
    %5 = arith.addf %2, %4 : vector<256x32xf32>
    %cst_5 = arith.constant 0.000000e+00 : f32
    %6 = vector.broadcast %cst_5 : f32 to vector<256x32xf32>
    %7 = arith.maximumf %5, %6 : vector<256x32xf32>
    %8 = arith.truncf %7 : vector<256x32xf32> to vector<256x32xbf16>
    %c0_6 = arith.constant 0 : index
    %c0_7 = arith.constant 0 : index
    %9 = vector.load %arg4[%c0_6, %c0_7] : memref<32x32xbf16, #tpu.memory_space<vmem>>, vector<32x32xbf16>
    %cst_8 = arith.constant dense<0.000000e+00> : vector<256x32xf32>
    %10 = tpu.matmul %8, %9, %cst_8 {dimension_numbers = #tpu.dot_dimension_numbers<[1], [0], [0], [1], [0, 0, 1, 1], [], []>} : vector<256x32xbf16>, vector<32x32xbf16>, vector<256x32xf32> -> vector<256x32xf32>
    %c0_9 = arith.constant 0 : index
    %c0_10 = arith.constant 0 : index
    %11 = vector.load %arg5[%c0_9, %c0_10] : memref<1x32xf32, #tpu.memory_space<vmem>>, vector<1x32xf32>
    %12 = vector.broadcast %11 : vector<1x32xf32> to vector<256x32xf32>
    %13 = arith.addf %10, %12 : vector<256x32xf32>
    %cst_11 = arith.constant 0.000000e+00 : f32
    %14 = vector.broadcast %cst_11 : f32 to vector<256x32xf32>
    %15 = arith.maximumf %13, %14 : vector<256x32xf32>
    %16 = arith.truncf %15 : vector<256x32xf32> to vector<256x32xbf16>
    %c0_12 = arith.constant 0 : index
    %c0_13 = arith.constant 0 : index
    %17 = vector.load %arg6[%c0_12, %c0_13] : memref<32x128xbf16, #tpu.memory_space<vmem>>, vector<32x128xbf16>
    %cst_14 = arith.constant dense<0.000000e+00> : vector<256x128xf32>
    %18 = tpu.matmul %16, %17, %cst_14 {dimension_numbers = #tpu.dot_dimension_numbers<[1], [0], [0], [1], [0, 0, 1, 1], [], []>} : vector<256x32xbf16>, vector<32x128xbf16>, vector<256x128xf32> -> vector<256x128xf32>
    %c0_15 = arith.constant 0 : index
    %c0_16 = arith.constant 0 : index
    %19 = vector.load %arg7[%c0_15, %c0_16] : memref<1x128xf32, #tpu.memory_space<vmem>>, vector<1x128xf32>
    %20 = vector.broadcast %19 : vector<1x128xf32> to vector<256x128xf32>
    %21 = arith.addf %18, %20 : vector<256x128xf32>
    %cst_17 = arith.constant dense<0xFF800000> : vector<256xf32>
    %22 = vector.multi_reduction <maximumf>, %21, %cst_17 [1] : vector<256x128xf32> to vector<256xf32>
    %23 = vector.shape_cast %22 : vector<256xf32> to vector<256x1xf32>
    %24 = vector.broadcast %23 : vector<256x1xf32> to vector<256x128xf32>
    %25 = arith.subf %21, %24 : vector<256x128xf32>
    %26 = math.exp %25 : vector<256x128xf32>
    %cst_18 = arith.constant dense<0.000000e+00> : vector<256xf32>
    %27 = vector.multi_reduction <add>, %26, %cst_18 [1] : vector<256x128xf32> to vector<256xf32>
    %28 = vector.shape_cast %27 : vector<256xf32> to vector<256x1xf32>
    %29 = math.log %28 : vector<256x1xf32>
    %30 = vector.broadcast %29 : vector<256x1xf32> to vector<256x128xf32>
    %31 = arith.subf %25, %30 : vector<256x128xf32>
    %c0_19 = arith.constant 0 : index
    %c0_20 = arith.constant 0 : index
    %32 = vector.load %arg8[%c0_19, %c0_20] : memref<256x128xf32, #tpu.memory_space<vmem>>, vector<256x128xf32>
    tpu.vector_store %arg8[%c0_19, %c0_20], %31 {strides = array<i32>} : memref<256x128xf32, #tpu.memory_space<vmem>>, vector<256x128xf32>,
    return
  }
  func.func @transform_0(%arg0: i32) -> (i32, i32) {
    %c0_i32 = arith.constant 0 : i32
    %c0_i32_0 = arith.constant 0 : i32
    return %arg0, %c0_i32 : i32, i32
  }
  func.func @transform_1(%arg0: i32) -> (i32, i32) {
    %c0_i32 = arith.constant 0 : i32
    %c0_i32_0 = arith.constant 0 : i32
    %c0_i32_1 = arith.constant 0 : i32
    return %c0_i32, %c0_i32_0 : i32, i32
  }
  func.func @transform_2(%arg0: i32) -> (i32, i32) {
    %c0_i32 = arith.constant 0 : i32
    %c0_i32_0 = arith.constant 0 : i32
    %c0_i32_1 = arith.constant 0 : i32
    return %c0_i32, %c0_i32_0 : i32, i32
  }
  func.func @transform_3(%arg0: i32) -> (i32, i32) {
    %c0_i32 = arith.constant 0 : i32
    %c0_i32_0 = arith.constant 0 : i32
    %c0_i32_1 = arith.constant 0 : i32
    return %c0_i32, %c0_i32_0 : i32, i32
  }
  func.func @transform_4(%arg0: i32) -> (i32, i32) {
    %c0_i32 = arith.constant 0 : i32
    %c0_i32_0 = arith.constant 0 : i32
    %c0_i32_1 = arith.constant 0 : i32
    return %c0_i32, %c0_i32_0 : i32, i32
  }
  func.func @transform_5(%arg0: i32) -> (i32, i32) {
    %c0_i32 = arith.constant 0 : i32
    %c0_i32_0 = arith.constant 0 : i32
    %c0_i32_1 = arith.constant 0 : i32
    return %c0_i32, %c0_i32_0 : i32, i32
  }
  func.func @transform_6(%arg0: i32) -> (i32, i32) {
    %c0_i32 = arith.constant 0 : i32
    %c0_i32_0 = arith.constant 0 : i32
    %c0_i32_1 = arith.constant 0 : i32
    return %c0_i32, %c0_i32_0 : i32, i32
  }
  func.func @transform_7(%arg0: i32) -> (i32, i32) {
    %c0_i32 = arith.constant 0 : i32
    %c0_i32_0 = arith.constant 0 : i32
    return %arg0, %c0_i32 : i32, i32
  }
}

</mosaic_0001>

<bundles_post_ra>
// kernel: discriminator_forward.1
= control target key start
LH: loop header
LB: loop body
LE: loop exit
PB: predicated region body
PF: predicated region fallthrough
CT: control target
= control target key end

     0   :  { %s1733_s24 = smov 0   ;;  %s2248_s0 = inlined_call_operand.vmem [shape: bf16[512,32], index: 0, kind: input, shape index: {}]   ;;  %s2249_s1 = inlined_call_operand.vmem [shape: bf16[32,32], index: 1, kind: input, shape index: {}]   ;;  %s2250_s2 = inlined_call_operand.vmem [shape: f32[1,32], index: 2, kind: input, shape index: {}]   ;;  %s2251_s3 = inlined_call_operand.vmem [shape: bf16[32,32], index: 3, kind: input, shape index: {}]   ;;  %s2252_s4 = inlined_call_operand.vmem [shape: f32[1,32], index: 4, kind: input, shape index: {}]   ;;  %s2253_s5 = inlined_call_operand.vmem [shape: bf16[32,128], index: 5, kind: input, shape index: {}]   ;;  %s2254_s6 = inlined_call_operand.vmem [shape: f32[1,128], index: 6, kind: input, shape index: {}]   ;;  %s2255_s7 = inlined_call_operand.vmem [shape: f32[512,128], index: 7, kind: output, shape index: {}]  }
   0x1 LB: > { %s1371_s25 = sadd.s32 4294967295, %s1691_s24   ;;  %p1375_p0 = scmp.ge.s32.totalorder %s1691_s24, 1  ;;  %s1691_s24 = sphi %s1733_s24, %s17_s24  }
   0x2   : > { %p238_p1 = scmp.lt.s32.totalorder %s1691_s24, 3 }
   0x4   : > { %p239_p2 = pnand %p1375_p0, %p238_p1 }
   0x5   : > { %s1376_s28 = sshll.u32 (!%p239_p2), %s1371_s25, 5 }
   0x6   : > { %242 = sbr.rel (%p239_p2) target bundleno = 880 (0x370), region = 48  ;;  %p271_p3 = scmp.lt.s32.totalorder (!%p239_p2), %s1376_s28, 63 }
   0xb   : > { %v1535_v0 = vld [vmem:[%s2249_s1 + $0x8] sm:$0xff]  ;;  %v1534_v1 = vld [vmem:[%s2249_s1] sm:$0xff]  ;;  %s2257_s28 = smov (!%p271_p3, %s1376_s28), 63  ;;  %vm415_vm0 = vcmask 261120  }
   0xc   : > { %470 = vmatpush.bf16.msra.mxu0 %v1535_v0  ;;  %1540 = vmatpush.bf16.msra.mxu3 %v1535_v0  ;;  %s1377_s8 = sshll.u32 %s2257_s28, 2  ;;  %v1537_v10 = vld [vmem:[%s2251_s3 + $0x8] sm:$0xff]  ;;  %v1536_v13 = vld [vmem:[%s2251_s3] sm:$0xff]  ;;  %s1379_s27 = sshll.u32 %s2257_s28, 3 }
   0xd   : > { %s1753_s11 = scalar_lea.vmem %s2248_s0, %s1377_s8  ;;  %675 = vmatpush.bf16.msra.mxu1 %v1537_v10  ;;  %v1789_v18 = vld [vmem:[%s2250_s2] ss:$0 sm:$0xff]  ;;  %s2136_s8 = scalar_lea.vmem %s2255_s7, %s1379_s27 }
   0xe   : > { %v1518_v2 = vld [vmem:[%s1753_s11] sm:$0xff]  ;;  %v1519_v4 = vld [vmem:[%s1753_s11 + $0x8] sm:$0xff]  ;;  %v1520_v6 = vld [vmem:[%s1753_s11 + $0x10] sm:$0xff] }
   0xf   : > { %v1530_v3 = vld [vmem:[%s1753_s11 + $0x60] sm:$0xff]  ;;  %v1531_v5 = vld [vmem:[%s1753_s11 + $0x68] sm:$0xff]  ;;  %v1532_v7 = vld [vmem:[%s1753_s11 + $0x70] sm:$0xff] }
  0x10   : > { %471 = vmatpush.bf16.msra.mxu0 %v1534_v1  ;;  %1541 = vmatpush.bf16.msra.mxu3 %v1534_v1  ;;  %v1521_v8 = vld [vmem:[%s1753_s11 + $0x18] sm:$0xff]  ;;  %v1522_v11 = vld [vmem:[%s1753_s11 + $0x20] sm:$0xff]  ;;  %v1523_v12 = vld [vmem:[%s1753_s11 + $0x28] sm:$0xff] }
  0x11   : > { %v1533_v9 = vld [vmem:[%s1753_s11 + $0x78] sm:$0xff]  ;;  %676 = vmatpush.bf16.msra.mxu1 %v1536_v13  ;;  %v1524_v14 = vld [vmem:[%s1753_s11 + $0x30] sm:$0xff]  ;;  %v1526_v16 = vld [vmem:[%s1753_s11 + $0x40] sm:$0xff] }
  0x12   : > { %v1525_v15 = vld [vmem:[%s1753_s11 + $0x38] sm:$0xff]  ;;  %v1527_v29 = vld [vmem:[%s1753_s11 + $0x48] sm:$0xff]  ;;  %v1528_v44 = vld [vmem:[%s1753_s11 + $0x50] sm:$0xff] }
  0x13   : > { %1452 = vmatmul.msk.bf16.vlgmr.msra.gmra.mxu0 %vm415_vm0, %v1518_v2  ;;  %1464 = vmatmul.msk.bf16.vlgmr.msra.gmra.mxu3 %vm415_vm0, %v1530_v3  ;;  %v1529_v60 = vld [vmem:[%s1753_s11 + $0x58] sm:$0xff] }
  0x14   : > { %1542 = vmatpush.bf16.msrb.mxu3 %v1537_v10 }
  0x18   : > { %1543 = vmatpush.bf16.msrb.mxu3 %v1536_v13 }
  0x23   : > { %1453 = vmatmul.msk.bf16.gmra.mxu0 %vm415_vm0, %v1519_v4  ;;  %1465 = vmatmul.msk.bf16.gmra.mxu3 %vm415_vm0, %v1531_v5 }
  0x33   : > { %1454 = vmatmul.msk.bf16.gmra.mxu0 %vm415_vm0, %v1520_v6  ;;  %1466 = vmatmul.msk.bf16.gmra.mxu3 %vm415_vm0, %v1532_v7 }
  0x43   : > { %1455 = vmatmul.msk.bf16.gmra.mxu0 %vm415_vm0, %v1521_v8  ;;  %1467 = vmatmul.msk.bf16.gmra.mxu3 %vm415_vm0, %v1533_v9 }
  0x53   : > { %1456 = vmatmul.msk.bf16.gmra.mxu0 %vm415_vm0, %v1522_v11 }
  0x63   : > { %1457 = vmatmul.msk.bf16.gmra.mxu0 %vm415_vm0, %v1523_v12 }
  0x73   : > { %1458 = vmatmul.msk.bf16.gmra.mxu0 %vm415_vm0, %v1524_v14 }
  0x83   : > { %1459 = vmatmul.msk.bf16.gmra.mxu0 %vm415_vm0, %v1525_v15 }
  0x90   : > { %v473_v17 = vpop.f32.mrf.mxu0 }
  0x91   : > { %v474_v20 = vadd.f32 %v1789_v18, %v473_v17 }
  0x93   : > { %1460 = vmatmul.msk.bf16.gmra.mxu0 %vm415_vm0, %v1526_v16  ;;  %v553_v23 = vmax.f32 %v474_v20, 0.0 }
  0x96   : > { %v533_v19 = vpop.f32.mrf.mxu3 }
  0x97   : > { %v534_v25 = vadd.f32 %v1789_v18, %v533_v19 }
  0x98   : > { %v475_v21 = vpop.f32.mrf.mxu0 }
  0x99   : > { %v476_v22 = vadd.f32 %v1789_v18, %v475_v21  ;;  %v577_v31 = vmax.f32 %v534_v25, 0.0  ;;  %v1539_v21 = vld [vmem:[%s2253_s5 + $0x8] sm:$0xff] }
  0x9a   : > { %1544 = vmatpush.bf16.msra.mxu3 %v1539_v21  ;;  %880 = vmatpush.bf16.msra.mxu2 %v1539_v21 }
  0x9b   : > { %v554_v24 = vmax.f32 %v476_v22, 0.0 }
  0x9d   : > { %v585_v26 = vpack.c.bf16 %v554_v24, %v553_v23 }
  0x9e   : > { %v535_v27 = vpop.f32.mrf.mxu3 }
  0x9f   : > { %v536_v28 = vadd.f32 %v1789_v18, %v535_v27  ;;  %1476 = vmatmul.msk.bf16.vlgmr.msra.gmra.mxu1 %vm415_vm0, %v585_v26 }
  0xa0   : > { %v478_v30 = vpop.f32.mrf.mxu0 }
  0xa1   : > { %v578_v32 = vmax.f32 %v536_v28, 0.0  ;;  %v479_v35 = vadd.f32 %v1789_v18, %v478_v30 }
  0xa3   : > { %v597_v33 = vpack.c.bf16 %v578_v32, %v577_v31  ;;  %1461 = vmatmul.msk.bf16.gmra.mxu0 %vm415_vm0, %v1527_v29  ;;  %v555_v38 = vmax.f32 %v479_v35, 0.0 }
  0xa5   : > { %1488 = vmatmul.msk.bf16.vlgmr.msrb.gmra.mxu3 %vm415_vm0, %v597_v33 }
  0xa6   : > { %v538_v34 = vpop.f32.mrf.mxu3 }
  0xa7   : > { %v539_v40 = vadd.f32 %v1789_v18, %v538_v34 }
  0xa8   : > { %v480_v36 = vpop.f32.mrf.mxu0 }
  0xa9   : > { %v481_v37 = vadd.f32 %v1789_v18, %v480_v36  ;;  %v579_v46 = vmax.f32 %v539_v40, 0.0  ;;  %v1538_v36 = vld [vmem:[%s2253_s5] sm:$0xff] }
  0xaa   : > { %1545 = vmatpush.bf16.msra.mxu3 %v1538_v36  ;;  %881 = vmatpush.bf16.msra.mxu2 %v1538_v36 }
  0xab   : > { %v556_v39 = vmax.f32 %v481_v37, 0.0 }
  0xad   : > { %v586_v41 = vpack.c.bf16 %v556_v39, %v555_v38 }
  0xae   : > { %v540_v42 = vpop.f32.mrf.mxu3 }
  0xaf   : > { %v541_v43 = vadd.f32 %v1789_v18, %v540_v42  ;;  %1477 = vmatmul.msk.bf16.gmra.mxu1 %vm415_vm0, %v586_v41 }
  0xb0   : > { %v483_v45 = vpop.f32.mrf.mxu0 }
  0xb1   : > { %v580_v47 = vmax.f32 %v541_v43, 0.0  ;;  %v484_v50 = vadd.f32 %v1789_v18, %v483_v45 }
  0xb3   : > { %v598_v48 = vpack.c.bf16 %v580_v47, %v579_v46  ;;  %1462 = vmatmul.msk.bf16.gmra.mxu0 %vm415_vm0, %v1528_v44  ;;  %v557_v53 = vmax.f32 %v484_v50, 0.0 }
  0xb5   : > { %1489 = vmatmul.msk.bf16.gmra.mxu3 %vm415_vm0, %v598_v48 }
  0xb6   : > { %v543_v49 = vpop.f32.mrf.mxu3 }
  0xb7   : > { %v544_v54 = vadd.f32 %v1789_v18, %v543_v49 }
  0xb8   : > { %v485_v51 = vpop.f32.mrf.mxu0 }
  0xb9   : > { %v486_v52 = vadd.f32 %v1789_v18, %v485_v51  ;;  %v581_v58 = vmax.f32 %v544_v54, 0.0 }
  0xbb   : > { %v558_v55 = vmax.f32 %v486_v52, 0.0  ;;  %v1845_v52 = vld [vmem:[%s2252_s4] ss:$0 sm:$0xff] }
  0xbd   : > { %v587_v56 = vpack.c.bf16 %v558_v55, %v557_v53 }
  0xbe   : > { %v545_v57 = vpop.f32.mrf.mxu3 }
  0xbf   : > { %v546_v59 = vadd.f32 %v1789_v18, %v545_v57  ;;  %1478 = vmatmul.msk.bf16.gmra.mxu1 %vm415_vm0, %v587_v56 }
  0xc0   : > { %v488_v61 = vpop.f32.mrf.mxu0 }
  0xc1   : > { %v582_v62 = vmax.f32 %v546_v59, 0.0  ;;  %v489_v1 = vadd.f32 %v1789_v18, %v488_v61 }
  0xc3   : > { %v599_v63 = vpack.c.bf16 %v582_v62, %v581_v58  ;;  %1463 = vmatmul.msk.bf16.gmra.mxu0 %vm415_vm0, %v1529_v60  ;;  %v559_v4 = vmax.f32 %v489_v1, 0.0 }
  0xc5   : > { %1490 = vmatmul.msk.bf16.gmra.mxu3 %vm415_vm0, %v599_v63 }
  0xc6   : > { %v548_v0 = vpop.f32.mrf.mxu3 }
  0xc7   : > { %v549_v5 = vadd.f32 %v1789_v18, %v548_v0 }
  0xc8   : > { %v490_v2 = vpop.f32.mrf.mxu0 }
  0xc9   : > { %v491_v3 = vadd.f32 %v1789_v18, %v490_v2  ;;  %v583_v9 = vmax.f32 %v549_v5, 0.0 }
  0xcb   : > { %v560_v6 = vmax.f32 %v491_v3, 0.0 }
  0xcd   : > { %v588_v7 = vpack.c.bf16 %v560_v6, %v559_v4 }
  0xce   : > { %v550_v8 = vpop.f32.mrf.mxu3 }
  0xcf   : > { %v551_v10 = vadd.f32 %v1789_v18, %v550_v8  ;;  %1479 = vmatmul.msk.bf16.gmra.mxu1 %vm415_vm0, %v588_v7 }
  0xd0   : > { %v493_v11 = vpop.f32.mrf.mxu0 }
  0xd1   : > { %v584_v12 = vmax.f32 %v551_v10, 0.0  ;;  %v494_v14 = vadd.f32 %v1789_v18, %v493_v11 }
  0xd3   : > { %v600_v13 = vpack.c.bf16 %v584_v12, %v583_v9  ;;  %v561_v17 = vmax.f32 %v494_v14, 0.0 }
  0xd5   : > { %1491 = vmatmul.msk.bf16.gmra.mxu3 %vm415_vm0, %v600_v13 }
  0xd8   : > { %v495_v15 = vpop.f32.mrf.mxu0 }
  0xd9   : > { %v496_v16 = vadd.f32 %v1789_v18, %v495_v15 }
  0xdb   : > { %v562_v19 = vmax.f32 %v496_v16, 0.0 }
  0xdd   : > { %v589_v20 = vpack.c.bf16 %v562_v19, %v561_v17 }
  0xdf   : > { %1480 = vmatmul.msk.bf16.gmra.mxu1 %vm415_vm0, %v589_v20 }
  0xe0   : > { %v498_v22 = vpop.f32.mrf.mxu0 }
  0xe1   : > { %v499_v23 = vadd.f32 %v1789_v18, %v498_v22 }
  0xe3   : > { %v563_v26 = vmax.f32 %v499_v23, 0.0 }
  0xe8   : > { %v500_v24 = vpop.f32.mrf.mxu0 }
  0xe9   : > { %v501_v25 = vadd.f32 %v1789_v18, %v500_v24 }
  0xeb   : > { %v564_v27 = vmax.f32 %v501_v25, 0.0 }
  0xed   : > { %v590_v28 = vpack.c.bf16 %v564_v27, %v563_v26 }
  0xef   : > { %1481 = vmatmul.msk.bf16.gmra.mxu1 %vm415_vm0, %v590_v28 }
  0xf0   : > { %v503_v29 = vpop.f32.mrf.mxu0 }
  0xf1   : > { %v504_v30 = vadd.f32 %v1789_v18, %v503_v29 }
  0xf3   : > { %v565_v33 = vmax.f32 %v504_v30, 0.0 }
  0xf8   : > { %v505_v31 = vpop.f32.mrf.mxu0 }
  0xf9   : > { %v506_v32 = vadd.f32 %v1789_v18, %v505_v31 }
  0xfb   : > { %v566_v34 = vmax.f32 %v506_v32, 0.0 }
  0xfd   : > { %v591_v35 = vpack.c.bf16 %v566_v34, %v565_v33 }
  0xff   : > { %1482 = vmatmul.msk.bf16.gmra.mxu1 %vm415_vm0, %v591_v35 }
 0x100   : > { %v508_v37 = vpop.f32.mrf.mxu0 }
 0x101   : > { %v509_v38 = vadd.f32 %v1789_v18, %v508_v37 }
 0x103   : > { %v567_v41 = vmax.f32 %v509_v38, 0.0 }
 0x108   : > { %v510_v39 = vpop.f32.mrf.mxu0 }
 0x109   : > { %v511_v40 = vadd.f32 %v1789_v18, %v510_v39 }
 0x10b   : > { %v568_v42 = vmax.f32 %v511_v40, 0.0 }
 0x10d   : > { %v592_v43 = vpack.c.bf16 %v568_v42, %v567_v41 }
 0x10f   : > { %1483 = vmatmul.msk.bf16.gmra.mxu1 %vm415_vm0, %v592_v43 }
 0x110   : > { %v513_v44 = vpop.f32.mrf.mxu0 }
 0x111   : > { %v514_v45 = vadd.f32 %v1789_v18, %v513_v44 }
 0x113   : > { %v569_v48 = vmax.f32 %v514_v45, 0.0 }
 0x118   : > { %v515_v46 = vpop.f32.mrf.mxu0 }
 0x119   : > { %v516_v47 = vadd.f32 %v1789_v18, %v515_v46 }
 0x11b   : > { %v570_v49 = vmax.f32 %v516_v47, 0.0 }
 0x11c   : > { %v678_v50 = vpop.f32.mrf.mxu1 }
 0x11d   : > { %v593_v51 = vpack.c.bf16 %v570_v49, %v569_v48  ;;  %v679_v54 = vadd.f32 %v1845_v52, %v678_v50 }
 0x11f   : > { %1484 = vmatmul.msk.bf16.gmra.mxu1 %vm415_vm0, %v593_v51  ;;  %v758_v57 = vmax.f32 %v679_v54, 0.0 }
 0x120   : > { %v518_v53 = vpop.f32.mrf.mxu0 }
 0x121   : > { %v519_v58 = vadd.f32 %v1789_v18, %v518_v53 }
 0x123   : > { %v571_v0 = vmax.f32 %v519_v58, 0.0 }
 0x124   : > { %v680_v55 = vpop.f32.mrf.mxu1 }
 0x125   : > { %v681_v56 = vadd.f32 %v1845_v52, %v680_v55 }
 0x127   : > { %v759_v59 = vmax.f32 %v681_v56, 0.0 }
 0x128   : > { %v520_v60 = vpop.f32.mrf.mxu0  ;;  %v738_v61 = vpop.f32.mrf.mxu3 }
 0x129   : > { %v790_v62 = vpack.c.bf16 %v759_v59, %v758_v57  ;;  %v521_v63 = vadd.f32 %v1789_v18, %v520_v60  ;;  %v739_v4 = vadd.f32 %v1845_v52, %v738_v61 }
 0x12b   : > { %v572_v1 = vmax.f32 %v521_v63, 0.0  ;;  %1500 = vmatmul.msk.bf16.vlgmr.msra.gmra.mxu2 %vm415_vm0, %v790_v62  ;;  %v782_v8 = vmax.f32 %v739_v4, 0.0 }
 0x12c   : > { %v683_v2 = vpop.f32.mrf.mxu1 }
 0x12d   : > { %v594_v3 = vpack.c.bf16 %v572_v1, %v571_v0  ;;  %v684_v9 = vadd.f32 %v1845_v52, %v683_v2 }
 0x12f   : > { %1485 = vmatmul.msk.bf16.gmra.mxu1 %vm415_vm0, %v594_v3  ;;  %v760_v14 = vmax.f32 %v684_v9, 0.0 }
 0x130   : > { %v523_v5 = vpop.f32.mrf.mxu0  ;;  %v740_v6 = vpop.f32.mrf.mxu3 }
 0x131   : > { %v741_v7 = vadd.f32 %v1845_v52, %v740_v6  ;;  %v524_v15 = vadd.f32 %v1789_v18, %v523_v5 }
 0x133   : > { %v783_v10 = vmax.f32 %v741_v7, 0.0  ;;  %v573_v22 = vmax.f32 %v524_v15, 0.0 }
 0x134   : > { %v685_v11 = vpop.f32.mrf.mxu1 }
 0x135   : > { %v802_v12 = vpack.c.bf16 %v783_v10, %v782_v8  ;;  %v686_v13 = vadd.f32 %v1845_v52, %v685_v11 }
 0x137   : > { %v761_v16 = vmax.f32 %v686_v13, 0.0  ;;  %1512 = vmatmul.msk.bf16.vlgmr.msra.gmra.mxu3 %vm415_vm0, %v802_v12 }
 0x138   : > { %v525_v17 = vpop.f32.mrf.mxu0  ;;  %v743_v19 = vpop.f32.mrf.mxu3 }
 0x139   : > { %v791_v20 = vpack.c.bf16 %v761_v16, %v760_v14  ;;  %v526_v21 = vadd.f32 %v1789_v18, %v525_v17  ;;  %v744_v26 = vadd.f32 %v1845_v52, %v743_v19 }
 0x13b   : > { %v574_v23 = vmax.f32 %v526_v21, 0.0  ;;  %1501 = vmatmul.msk.bf16.gmra.mxu2 %vm415_vm0, %v791_v20  ;;  %v784_v30 = vmax.f32 %v744_v26, 0.0 }
 0x13c   : > { %v688_v24 = vpop.f32.mrf.mxu1 }
 0x13d   : > { %v595_v25 = vpack.c.bf16 %v574_v23, %v573_v22  ;;  %v689_v31 = vadd.f32 %v1845_v52, %v688_v24 }
 0x13f   : > { %1486 = vmatmul.msk.bf16.gmra.mxu1 %vm415_vm0, %v595_v25  ;;  %v762_v36 = vmax.f32 %v689_v31, 0.0 }
 0x140   : > { %v528_v27 = vpop.f32.mrf.mxu0  ;;  %v745_v28 = vpop.f32.mrf.mxu3 }
 0x141   : > { %v746_v29 = vadd.f32 %v1845_v52, %v745_v28  ;;  %v529_v37 = vadd.f32 %v1789_v18, %v528_v27 }
 0x143   : > { %v785_v32 = vmax.f32 %v746_v29, 0.0  ;;  %v575_v43 = vmax.f32 %v529_v37, 0.0 }
 0x144   : > { %v690_v33 = vpop.f32.mrf.mxu1 }
 0x145   : > { %v803_v34 = vpack.c.bf16 %v785_v32, %v784_v30  ;;  %v691_v35 = vadd.f32 %v1845_v52, %v690_v33 }
 0x147   : > { %v763_v38 = vmax.f32 %v691_v35, 0.0  ;;  %1513 = vmatmul.msk.bf16.gmra.mxu3 %vm415_vm0, %v803_v34 }
 0x148   : > { %v530_v39 = vpop.f32.mrf.mxu0  ;;  %v748_v40 = vpop.f32.mrf.mxu3 }
 0x149   : > { %v792_v41 = vpack.c.bf16 %v763_v38, %v762_v36  ;;  %v531_v42 = vadd.f32 %v1789_v18, %v530_v39  ;;  %v749_v47 = vadd.f32 %v1845_v52, %v748_v40  ;;  %v1899_v38 = vld [vmem:[%s2254_s6] ss:$0 sm:$0xff] }
 0x14b   : > { %v576_v44 = vmax.f32 %v531_v42, 0.0  ;;  %1502 = vmatmul.msk.bf16.gmra.mxu2 %vm415_vm0, %v792_v41  ;;  %v786_v49 = vmax.f32 %v749_v47, 0.0 }
 0x14c   : > { %v693_v45 = vpop.f32.mrf.mxu1 }
 0x14d   : > { %v596_v46 = vpack.c.bf16 %v576_v44, %v575_v43  ;;  %v694_v51 = vadd.f32 %v1845_v52, %v693_v45 }
 0x14f   : > { %1487 = vmatmul.msk.bf16.gmra.mxu1 %vm415_vm0, %v596_v46  ;;  %v764_v56 = vmax.f32 %v694_v51, 0.0 }
 0x150   : > { %v750_v48 = vpop.f32.mrf.mxu3 }
 0x151   : > { %v751_v50 = vadd.f32 %v1845_v52, %v750_v48 }
 0x153   : > { %v787_v53 = vmax.f32 %v751_v50, 0.0 }
 0x154   : > { %v695_v54 = vpop.f32.mrf.mxu1 }
 0x155   : > { %v804_v55 = vpack.c.bf16 %v787_v53, %v786_v49  ;;  %v696_v18 = vadd.f32 %v1845_v52, %v695_v54 }
 0x157   : > { %v765_v57 = vmax.f32 %v696_v18, 0.0  ;;  %1514 = vmatmul.msk.bf16.gmra.mxu3 %vm415_vm0, %v804_v55 }
 0x158   : > { %v753_v58 = vpop.f32.mrf.mxu3 }
 0x159   : > { %v793_v59 = vpack.c.bf16 %v765_v57, %v764_v56  ;;  %v754_v61 = vadd.f32 %v1845_v52, %v753_v58 }
 0x15b   : > { %1503 = vmatmul.msk.bf16.gmra.mxu2 %vm415_vm0, %v793_v59  ;;  %v788_v63 = vmax.f32 %v754_v61, 0.0 }
 0x15c   : > { %v698_v60 = vpop.f32.mrf.mxu1 }
 0x15d   : > { %v699_v1 = vadd.f32 %v1845_v52, %v698_v60 }
 0x15f   : > { %v766_v6 = vmax.f32 %v699_v1, 0.0 }
 0x160   : > { %v755_v62 = vpop.f32.mrf.mxu3 }
 0x161   : > { %v756_v0 = vadd.f32 %v1845_v52, %v755_v62 }
 0x163   : > { %v789_v2 = vmax.f32 %v756_v0, 0.0 }
 0x164   : > { %v700_v3 = vpop.f32.mrf.mxu1 }
 0x165   : > { %v805_v4 = vpack.c.bf16 %v789_v2, %v788_v63  ;;  %v701_v5 = vadd.f32 %v1845_v52, %v700_v3 }
 0x167   : > { %v767_v7 = vmax.f32 %v701_v5, 0.0  ;;  %1515 = vmatmul.msk.bf16.gmra.mxu3 %vm415_vm0, %v805_v4 }
 0x169   : > { %v794_v8 = vpack.c.bf16 %v767_v7, %v766_v6 }
 0x16b   : > { %1504 = vmatmul.msk.bf16.gmra.mxu2 %vm415_vm0, %v794_v8 }
 0x16c   : > { %v703_v9 = vpop.f32.mrf.mxu1 }
 0x16d   : > { %v704_v10 = vadd.f32 %v1845_v52, %v703_v9 }
 0x16f   : > { %v768_v13 = vmax.f32 %v704_v10, 0.0 }
 0x174   : > { %v705_v11 = vpop.f32.mrf.mxu1 }
 0x175   : > { %v706_v12 = vadd.f32 %v1845_v52, %v705_v11 }
 0x177   : > { %v769_v14 = vmax.f32 %v706_v12, 0.0 }
 0x179   : > { %v795_v15 = vpack.c.bf16 %v769_v14, %v768_v13 }
 0x17b   : > { %1505 = vmatmul.msk.bf16.gmra.mxu2 %vm415_vm0, %v795_v15 }
 0x17c   : > { %v708_v16 = vpop.f32.mrf.mxu1 }
 0x17d   : > { %v709_v17 = vadd.f32 %v1845_v52, %v708_v16 }
 0x17f   : > { %v770_v21 = vmax.f32 %v709_v17, 0.0 }
 0x184   : > { %v710_v19 = vpop.f32.mrf.mxu1 }
 0x185   : > { %v711_v20 = vadd.f32 %v1845_v52, %v710_v19 }
 0x187   : > { %v771_v22 = vmax.f32 %v711_v20, 0.0 }
 0x189   : > { %v796_v23 = vpack.c.bf16 %v771_v22, %v770_v21 }
 0x18b   : > { %1506 = vmatmul.msk.bf16.gmra.mxu2 %vm415_vm0, %v796_v23 }
 0x18c   : > { %v713_v24 = vpop.f32.mrf.mxu1 }
 0x18d   : > { %v714_v25 = vadd.f32 %v1845_v52, %v713_v24 }
 0x18f   : > { %v772_v28 = vmax.f32 %v714_v25, 0.0 }
 0x194   : > { %v715_v26 = vpop.f32.mrf.mxu1 }
 0x195   : > { %v716_v27 = vadd.f32 %v1845_v52, %v715_v26 }
 0x197   : > { %v773_v29 = vmax.f32 %v716_v27, 0.0 }
 0x199   : > { %v797_v30 = vpack.c.bf16 %v773_v29, %v772_v28 }
 0x19b   : > { %1507 = vmatmul.msk.bf16.gmra.mxu2 %vm415_vm0, %v797_v30 }
 0x19c   : > { %v718_v31 = vpop.f32.mrf.mxu1 }
 0x19d   : > { %v719_v32 = vadd.f32 %v1845_v52, %v718_v31 }
 0x19f   : > { %v774_v35 = vmax.f32 %v719_v32, 0.0 }
 0x1a4   : > { %v720_v33 = vpop.f32.mrf.mxu1 }
 0x1a5   : > { %v721_v34 = vadd.f32 %v1845_v52, %v720_v33 }
 0x1a7   : > { %v775_v36 = vmax.f32 %v721_v34, 0.0 }
 0x1a9   : > { %v798_v37 = vpack.c.bf16 %v775_v36, %v774_v35 }
 0x1ab   : > { %1508 = vmatmul.msk.bf16.gmra.mxu2 %vm415_vm0, %v798_v37 }
 0x1ac   : > { %v723_v39 = vpop.f32.mrf.mxu1 }
 0x1ad   : > { %v724_v42 = vadd.f32 %v1845_v52, %v723_v39 }
 0x1ae   : > { %v883_v40 = vpop.f32.mrf.mxu2 }
 0x1af   : > { %v1902_v41 = vadd.f32 %v1899_v38, %v883_v40  ;;  %v776_v46 = vmax.f32 %v724_v42, 0.0 }
 0x1b1   : > { %963 = vmax.xlane.f32.xlu0 %v1902_v41 }
 0x1b4   : > { %v725_v43 = vpop.f32.mrf.mxu1 }
 0x1b5   : > { %v726_v44 = vadd.f32 %v1845_v52, %v725_v43 }
 0x1b6   : > { %v885_v45 = vpop.f32.mrf.mxu2 }
 0x1b7   : > { %v777_v47 = vmax.f32 %v726_v44, 0.0  ;;  %v1908_v48 = vadd.f32 %v1899_v38, %v885_v45 }
 0x1b9   : > { %v799_v49 = vpack.c.bf16 %v777_v47, %v776_v46  ;;  %965 = vmax.xlane.f32.xlu0 %v1908_v48 }
 0x1ba   : > { %v943_v50 = vpop.f32.mrf.mxu3 }
 0x1bb   : > { %1509 = vmatmul.msk.bf16.gmra.mxu2 %vm415_vm0, %v799_v49  ;;  %v1913_v54 = vadd.f32 %v1899_v38, %v943_v50 }
 0x1bc   : > { %v728_v51 = vpop.f32.mrf.mxu1 }
 0x1bd   : > { %v729_v56 = vadd.f32 %v1845_v52, %v728_v51 }
 0x1be   : > { %v888_v53 = vpop.f32.mrf.mxu2 }
 0x1bf   : > { %v1916_v55 = vadd.f32 %v1899_v38, %v888_v53  ;;  %v778_v60 = vmax.f32 %v729_v56, 0.0 }
 0x1c1   : > { %967 = vmax.xlane.f32.xlu1 %v1916_v55  ;;  %1011 = vmax.xlane.f32.xlu0 %v1913_v54 }
 0x1c2   : > { %v945_v18 = vpop.f32.mrf.mxu3 }
 0x1c3   : > { %v1923_v61 = vadd.f32 %v1899_v38, %v945_v18 }
 0x1c4   : > { %v730_v57 = vpop.f32.mrf.mxu1 }
 0x1c5   : > { %v731_v58 = vadd.f32 %v1845_v52, %v730_v57 }
 0x1c6   : > { %v890_v59 = vpop.f32.mrf.mxu2 }
 0x1c7   : > { %v779_v62 = vmax.f32 %v731_v58, 0.0  ;;  %v1932_v4 = vadd.f32 %v1899_v38, %v890_v59 }
 0x1c9   : > { %v800_v63 = vpack.c.bf16 %v779_v62, %v778_v60  ;;  %1013 = vmax.xlane.f32.xlu1 %v1923_v61 }
 0x1ca   : > { %v948_v0 = vpop.f32.mrf.mxu3 }
 0x1cb   : > { %v1927_v1 = vadd.f32 %v1899_v38, %v948_v0  ;;  %1510 = vmatmul.msk.bf16.gmra.mxu2 %vm415_vm0, %v800_v63 }
 0x1cc   : > { %v733_v2 = vpop.f32.mrf.mxu1 }
 0x1cd   : > { %1015 = vmax.xlane.f32.xlu2 %v1927_v1  ;;  %v734_v6 = vadd.f32 %v1845_v52, %v733_v2 }
 0x1ce   : > { %v893_v3 = vpop.f32.mrf.mxu2 }
 0x1cf   : > { %v1937_v7 = vadd.f32 %v1899_v38, %v893_v3  ;;  %v780_v12 = vmax.f32 %v734_v6, 0.0 }
 0x1d1   : > { %969 = vmax.xlane.f32.xlu1 %v1932_v4 }
 0x1d2   : > { %v950_v5 = vpop.f32.mrf.mxu3 }
 0x1d3   : > { %v1940_v8 = vadd.f32 %v1899_v38, %v950_v5 }
 0x1d4   : > { %v735_v9 = vpop.f32.mrf.mxu1 }
 0x1d5   : > { %v736_v10 = vadd.f32 %v1845_v52, %v735_v9  ;;  %971 = vmax.xlane.f32.xlu2 %v1937_v7  ;;  %1017 = vmax.xlane.f32.xlu0 %v1940_v8 }
 0x1d6   : > { %v895_v11 = vpop.f32.mrf.mxu2 }
 0x1d7   : > { %v781_v13 = vmax.f32 %v736_v10, 0.0  ;;  %v1946_v16 = vadd.f32 %v1899_v38, %v895_v11 }
 0x1d9   : > { %v801_v14 = vpack.c.bf16 %v781_v13, %v780_v12 }
 0x1da   : > { %v953_v15 = vpop.f32.mrf.mxu3 }
 0x1db   : > { %v1949_v17 = vadd.f32 %v1899_v38, %v953_v15  ;;  %1511 = vmatmul.msk.bf16.gmra.mxu2 %vm415_vm0, %v801_v14 }
 0x1dd   : > { %973 = vmax.xlane.f32.xlu2 %v1946_v16  ;;  %1019 = vmax.xlane.f32.xlu1 %v1949_v17 }
 0x1de   : > { %v898_v52 = vpop.f32.mrf.mxu2 }
 0x1df   : > { %v1955_v19 = vadd.f32 %v1899_v38, %v898_v52 }
 0x1e1   : > { %975 = vmax.xlane.f32.xlu0 %v1955_v19 }
 0x1e2   : > { %v955_v20 = vpop.f32.mrf.mxu3 }
 0x1e3   : > { %v1959_v21 = vadd.f32 %v1899_v38, %v955_v20 }
 0x1e5   : > { %1021 = vmax.xlane.f32.xlu2 %v1959_v21 }
 0x1e6   : > { %v900_v22 = vpop.f32.mrf.mxu2 }
 0x1e7   : > { %v1963_v23 = vadd.f32 %v1899_v38, %v900_v22 }
 0x1e9   : > { %977 = vmax.xlane.f32.xlu1 %v1963_v23 }
 0x1ea   : > { %v958_v24 = vpop.f32.mrf.mxu3 }
 0x1eb   : > { %v1967_v25 = vadd.f32 %v1899_v38, %v958_v24 }
 0x1ed   : > { %1023 = vmax.xlane.f32.xlu0 %v1967_v25 }
 0x1ee   : > { %v903_v26 = vpop.f32.mrf.mxu2 }
 0x1ef   : > { %v1971_v27 = vadd.f32 %v1899_v38, %v903_v26 }
 0x1f1   : > { %979 = vmax.xlane.f32.xlu2 %v1971_v27 }
 0x1f2   : > { %v960_v28 = vpop.f32.mrf.mxu3 }
 0x1f3   : > { %v1975_v29 = vadd.f32 %v1899_v38, %v960_v28 }
 0x1f5   : > { %1025 = vmax.xlane.f32.xlu1 %v1975_v29 }
 0x1f6   : > { %v905_v30 = vpop.f32.mrf.mxu2 }
 0x1f7   : > { %v1979_v31 = vadd.f32 %v1899_v38, %v905_v30 }
 0x1f9   : > { %981 = vmax.xlane.f32.xlu0 %v1979_v31 }
 0x1fe   : > { %v908_v32 = vpop.f32.mrf.mxu2 }
 0x1ff   : > { %v1983_v33 = vadd.f32 %v1899_v38, %v908_v32 }
 0x201   : > { %983 = vmax.xlane.f32.xlu1 %v1983_v33 }
 0x206   : > { %v910_v34 = vpop.f32.mrf.mxu2 }
 0x207   : > { %v1987_v35 = vadd.f32 %v1899_v38, %v910_v34 }
 0x209   : > { %985 = vmax.xlane.f32.xlu2 %v1987_v35 }
 0x20e   : > { %v913_v36 = vpop.f32.mrf.mxu2 }
 0x20f   : > { %v1991_v37 = vadd.f32 %v1899_v38, %v913_v36 }
 0x211   : > { %987 = vmax.xlane.f32.xlu0 %v1991_v37 }
 0x216   : > { %v915_v39 = vpop.f32.mrf.mxu2 }
 0x217   : > { %v1995_v40 = vadd.f32 %v1899_v38, %v915_v39 }
 0x219   : > { %989 = vmax.xlane.f32.xlu1 %v1995_v40 }
 0x21e   : > { %v918_v42 = vpop.f32.mrf.mxu2 }
 0x21f   : > { %v1999_v43 = vadd.f32 %v1899_v38, %v918_v42 }
 0x221   : > { %991 = vmax.xlane.f32.xlu2 %v1999_v43 }
 0x224   : > { %v964_v44 = vpop.xlane.xlu0 %963 }
 0x225   : > { %v2003_v45 = vsub.f32 %v1902_v41, %v964_v44 }
 0x226   : > { %v920_v46 = vpop.f32.mrf.mxu2 }
 0x227   : > { %v1059_v47 = vmul.f32 1.442695, %v2003_v45  ;;  %v2007_v49 = vadd.f32 %v1899_v38, %v920_v46 }
 0x229   : > { %1557 = vpow2.f32 %v1059_v47  ;;  %993 = vmax.xlane.f32.xlu0 %v2007_v49 }
 0x22c   : > { %v966_v50 = vpop.xlane.xlu0 %965 }
 0x22d   : > { %v2011_v51 = vsub.f32 %v1908_v48, %v966_v50 }
 0x22e   : > { %v923_v53 = vpop.f32.mrf.mxu2 }
 0x22f   : > { %v1558_v18 = vpop.eup %1557  ;;  %v1061_v56 = vmul.f32 1.442695, %v2011_v51  ;;  %v2015_v41 = vadd.f32 %v1899_v38, %v923_v53 }
 0x230   : > { %1123 = vadd.xlane.f32.xlu2 %v1558_v18 }
 0x231   : > { %1559 = vpow2.f32 %v1061_v56  ;;  %995 = vmax.xlane.f32.xlu1 %v2015_v41 }
 0x234   : > { %v968_v57 = vpop.xlane.xlu1 %967  ;;  %v1012_v58 = vpop.xlane.xlu0 %1011 }
 0x235   : > { %v2019_v59 = vsub.f32 %v1916_v55, %v968_v57  ;;  %v2022_v60 = vsub.f32 %v1913_v54, %v1012_v58 }
 0x236   : > { %v925_v48 = vpop.f32.mrf.mxu2 }
 0x237   : > { %v1560_v62 = vpop.eup %1559  ;;  %v1063_v63 = vmul.f32 1.442695, %v2019_v59  ;;  %v1107_v0 = vmul.f32 1.442695, %v2022_v60  ;;  %v2027_v2 = vadd.f32 %v1899_v38, %v925_v48 }
 0x238   : > { %1125 = vadd.xlane.f32.xlu0 %v1560_v62 }
 0x239   : > { %1561 = vpow2.f32 %v1063_v63  ;;  %997 = vmax.xlane.f32.xlu2 %v2027_v2 }
 0x23a   : > { %1563 = vpow2.f32 %v1107_v0 }
 0x23c   : > { %v1014_v3 = vpop.xlane.xlu1 %1013 }
 0x23d   : > { %v2031_v55 = vsub.f32 %v1923_v61, %v1014_v3 }
 0x23e   : > { %v928_v54 = vpop.f32.mrf.mxu2 }
 0x23f   : > { %v1562_v5 = vpop.eup %1561  ;;  %v1109_v6 = vmul.f32 1.442695, %v2031_v55  ;;  %v2035_v9 = vadd.f32 %v1899_v38, %v928_v54 }
 0x240   : > { %v1564_v10 = vpop.eup %1563  ;;  %v1016_v11 = vpop.xlane.xlu2 %1015  ;;  %1127 = vadd.xlane.f32.xlu1 %v1562_v5 }
 0x241   : > { %1565 = vpow2.f32 %v1109_v6  ;;  %999 = vmax.xlane.f32.xlu0 %v2035_v9  ;;  %1171 = vadd.xlane.f32.xlu2 %v1564_v10  ;;  %v2039_v12 = vsub.f32 %v1927_v1, %v1016_v11 }
 0x243   : > { %v1111_v14 = vmul.f32 1.442695, %v2039_v12 }
 0x244   : > { %v970_v13 = vpop.xlane.xlu1 %969 }
 0x245   : > { %v2042_v61 = vsub.f32 %v1932_v4, %v970_v13 }
 0x246   : > { %v930_v15 = vpop.f32.mrf.mxu2 }
 0x247   : > { %v1566_v52 = vpop.eup %1565  ;;  %v1065_v20 = vmul.f32 1.442695, %v2042_v61  ;;  %v2047_v22 = vadd.f32 %v1899_v38, %v930_v15 }
 0x248   : > { %v972_v24 = vpop.xlane.xlu2 %971  ;;  %v1018_v4 = vpop.xlane.xlu0 %1017 }
 0x249   : > { %1567 = vpow2.f32 %v1065_v20  ;;  %v2050_v26 = vsub.f32 %v1937_v7, %v972_v24  ;;  %1001 = vmax.xlane.f32.xlu1 %v2047_v22  ;;  %1173 = vadd.xlane.f32.xlu0 %v1566_v52  ;;  %v2080_v0 = vsub.f32 %v1940_v8, %v1018_v4 }
 0x24a   : > { %1569 = vpow2.f32 %v1111_v14 }
 0x24b   : > { %v1067_v1 = vmul.f32 1.442695, %v2050_v26 }
 0x24d   : > { %1571 = vpow2.f32 %v1067_v1 }
 0x24e   : > { %v933_v28 = vpop.f32.mrf.mxu2 }
 0x24f   : > { %v1568_v30 = vpop.eup %1567  ;;  %v2062_v47 = vadd.f32 %v1899_v38, %v933_v28 }
 0x250   : > { %v1570_v32 = vpop.eup %1569  ;;  %v974_v34 = vpop.xlane.xlu2 %973  ;;  %1129 = vadd.xlane.f32.xlu2 %v1568_v30 }
 0x251   : > { %v2055_v36 = vsub.f32 %v1946_v16, %v974_v34  ;;  %1175 = vadd.xlane.f32.xlu1 %v1570_v32  ;;  %v1020_v42 = vpop.xlane.xlu1 %1019 }
 0x252   : > { %v2077_v63 = vsub.f32 %v1949_v17, %v1020_v42  ;;  %v1113_v17 = vmul.f32 1.442695, %v2080_v0 }
 0x253   : > { %v1572_v39 = vpop.eup %1571  ;;  %v1069_v7 = vmul.f32 1.442695, %v2055_v36 }
 0x254   : > { %1131 = vadd.xlane.f32.xlu0 %v1572_v39  ;;  %v976_v44 = vpop.xlane.xlu0 %975  ;;  %v1115_v54 = vmul.f32 1.442695, %v2077_v63 }
 0x255   : > { %1573 = vpow2.f32 %v1069_v7  ;;  %v2059_v46 = vsub.f32 %v1955_v19, %v976_v44 }
 0x256   : > { %v935_v50 = vpop.f32.mrf.mxu2 }
 0x257   : > { %v1071_v53 = vmul.f32 1.442695, %v2059_v46  ;;  %v2067_v16 = vadd.f32 %v1899_v38, %v935_v50 }
 0x258   : > { %1003 = vmax.xlane.f32.xlu2 %v2062_v47  ;;  %v2069_v56 = vpop.xlane.xlu2 %1021 }
 0x259   : > { %1575 = vpow2.f32 %v1071_v53 }
 0x25b   : > { %v1574_v18 = vpop.eup %1573 }
 0x25c   : > { %1133 = vadd.xlane.f32.xlu1 %v1574_v18  ;;  %v978_v57 = vpop.xlane.xlu1 %977  ;;  %1005 = vmax.xlane.f32.xlu0 %v2067_v16 }
 0x25d   : > { %v2073_v19 = vsub.f32 %v1963_v23, %v978_v57 }
 0x25e   : > { %v938_v58 = vpop.f32.mrf.mxu2 }
 0x25f   : > { %v1576_v48 = vpop.eup %1575  ;;  %v1073_v62 = vmul.f32 1.442695, %v2073_v19  ;;  %v2083_v3 = vadd.f32 %v1899_v38, %v938_v58 }
 0x260   : > { %1135 = vadd.xlane.f32.xlu2 %v1576_v48  ;;  %v2086_v5 = vpop.xlane.xlu0 %1023 }
 0x261   : > { %1577 = vpow2.f32 %v1073_v62 }
 0x262   : > { %1579 = vpow2.f32 %v1115_v54 }
 0x264   : > { %v980_v23 = vpop.xlane.xlu2 %979  ;;  %1007 = vmax.xlane.f32.xlu1 %v2083_v3 }
 0x265   : > { %v2090_v6 = vsub.f32 %v1971_v27, %v980_v23 }
 0x266   : > { %v940_v10 = vpop.f32.mrf.mxu2 }
 0x267   : > { %v1578_v11 = vpop.eup %1577  ;;  %v1075_v8 = vmul.f32 1.442695, %v2090_v6  ;;  %v2095_v13 = vadd.f32 %v1899_v38, %v940_v10 }
 0x268   : > { %1137 = vadd.xlane.f32.xlu0 %v1578_v11  ;;  %v2098_v14 = vpop.xlane.xlu1 %1025  ;;  %v1580_v52 = vpop.eup %1579 }
 0x269   : > { %1581 = vpow2.f32 %v1075_v8  ;;  %1009 = vmax.xlane.f32.xlu2 %v2095_v13 }
 0x26a   : > { %1583 = vpow2.f32 %v1113_v17 }
 0x26c   : > { %v982_v15 = vpop.xlane.xlu0 %981 }
 0x26d   : > { %v2101_v27 = vsub.f32 %v1979_v31, %v982_v15 }
 0x26f   : > { %v1582_v20 = vpop.eup %1581  ;;  %v1077_v24 = vmul.f32 1.442695, %v2101_v27 }
 0x270   : > { %v1584_v1 = vpop.eup %1583  ;;  %1139 = vadd.xlane.f32.xlu1 %v1582_v20  ;;  %1179 = vadd.xlane.f32.xlu0 %v1580_v52 }
 0x271   : > { %1585 = vpow2.f32 %v1077_v24  ;;  %1177 = vadd.xlane.f32.xlu2 %v1584_v1 }
 0x274   : > { %v984_v38 = vpop.xlane.xlu1 %983 }
 0x275   : > { %v2105_v4 = vsub.f32 %v1983_v33, %v984_v38 }
 0x277   : > { %v1586_v28 = vpop.eup %1585  ;;  %v1079_v30 = vmul.f32 1.442695, %v2105_v4 }
 0x279   : > { %1587 = vpow2.f32 %v1079_v30  ;;  %1141 = vadd.xlane.f32.xlu2 %v1586_v28 }
 0x27c   : > { %v986_v31 = vpop.xlane.xlu2 %985 }
 0x27d   : > { %v2109_v32 = vsub.f32 %v1987_v35, %v986_v31 }
 0x27f   : > { %v1588_v34 = vpop.eup %1587  ;;  %v1081_v39 = vmul.f32 1.442695, %v2109_v32 }
 0x280   : > { %1143 = vadd.xlane.f32.xlu0 %v1588_v34 }
 0x281   : > { %1589 = vpow2.f32 %v1081_v39 }
 0x284   : > { %v988_v7 = vpop.xlane.xlu0 %987 }
 0x285   : > { %v2113_v42 = vsub.f32 %v1991_v37, %v988_v7 }
 0x287   : > { %v1590_v33 = vpop.eup %1589  ;;  %v1083_v44 = vmul.f32 1.442695, %v2113_v42 }
 0x288   : > { %1145 = vadd.xlane.f32.xlu1 %v1590_v33 }
 0x289   : > { %1591 = vpow2.f32 %v1083_v44 }
 0x28c   : > { %v990_v50 = vpop.xlane.xlu1 %989 }
 0x28d   : > { %v2117_v53 = vsub.f32 %v1995_v40, %v990_v50 }
 0x28f   : > { %v1592_v35 = vpop.eup %1591  ;;  %v1085_v18 = vmul.f32 1.442695, %v2117_v53 }
 0x290   : > { %1147 = vadd.xlane.f32.xlu2 %v1592_v35 }
 0x291   : > { %1593 = vpow2.f32 %v1085_v18 }
 0x294   : > { %v992_v57 = vpop.xlane.xlu2 %991 }
 0x295   : > { %v2121_v58 = vsub.f32 %v1999_v43, %v992_v57 }
 0x297   : > { %v1594_v37 = vpop.eup %1593  ;;  %v1087_v48 = vmul.f32 1.442695, %v2121_v58 }
 0x298   : > { %1149 = vadd.xlane.f32.xlu0 %v1594_v37 }
 0x299   : > { %1595 = vpow2.f32 %v1087_v48 }
 0x29c   : > { %v994_v62 = vpop.xlane.xlu0 %993 }
 0x29d   : > { %v2125_v54 = vsub.f32 %v2007_v49, %v994_v62 }
 0x29f   : > { %v1596_v40 = vpop.eup %1595  ;;  %v1089_v23 = vmul.f32 1.442695, %v2125_v54 }
 0x2a0   : > { %1151 = vadd.xlane.f32.xlu1 %v1596_v40 }
 0x2a1   : > { %1597 = vpow2.f32 %v1089_v23 }
 0x2a3   : > { %v1124_v17 = vpop.xlane.xlu2 %1123 }
 0x2a4   : > { %1599 = vlog2.f32 %v1124_v17  ;;  %v996_v10 = vpop.xlane.xlu1 %995 }
 0x2a5   : > { %v2129_v43 = vsub.f32 %v2015_v41, %v996_v10 }
 0x2a7   : > { %v1598_v11 = vpop.eup %1597  ;;  %v1091_v8 = vmul.f32 1.442695, %v2129_v43 }
 0x2a8   : > { %1153 = vadd.xlane.f32.xlu2 %v1598_v11 }
 0x2a9   : > { %1601 = vpow2.f32 %v1091_v8 }
 0x2aa   : > { %v1600_v15 = vpop.eup %1599 }
 0x2ab   : > { %v1188_v49 = vmul.f32 0.6931472, %v1600_v15  ;;  %v1126_v52 = vpop.xlane.xlu0 %1125 }
 0x2ac   : > { %1603 = vlog2.f32 %v1126_v52  ;;  %v998_v20 = vpop.xlane.xlu2 %997 }
 0x2ad   : > { %v1251_v41 = vsub.f32 %v2003_v45, %v1188_v49  ;;  %v2140_v24 = vsub.f32 %v2027_v2, %v998_v20 }
 0x2af   : > { %v1602_v1 = vpop.eup %1601  ;;  %1283 = vst [vmem:[%s2136_s8] sm:$0xff] %v1251_v41  ;;  %v1093_v38 = vmul.f32 1.442695, %v2140_v24 }
 0x2b0   : > { %1155 = vadd.xlane.f32.xlu0 %v1602_v1 }
 0x2b1   : > { %1605 = vpow2.f32 %v1093_v38 }
 0x2b2   : > { %v1604_v28 = vpop.eup %1603 }
 0x2b3   : > { %v1190_v30 = vmul.f32 0.6931472, %v1604_v28  ;;  %v1128_v31 = vpop.xlane.xlu1 %1127 }
 0x2b4   : > { %1607 = vlog2.f32 %v1128_v31  ;;  %v1172_v34 = vpop.xlane.xlu2 %1171  ;;  %v1000_v39 = vpop.xlane.xlu0 %999 }
 0x2b5   : > { %v1252_v7 = vsub.f32 %v2011_v51, %v1190_v30  ;;  %1609 = vlog2.f32 %v1172_v34  ;;  %v2146_v45 = vsub.f32 %v2035_v9, %v1000_v39 }
 0x2b7   : > { %v1606_v2 = vpop.eup %1605  ;;  %1284 = vst [vmem:[%s2136_s8 + $0x8] sm:$0xff] %v1252_v7  ;;  %v1095_v33 = vmul.f32 1.442695, %v2146_v45 }
 0x2b8   : > { %1157 = vadd.xlane.f32.xlu1 %v1606_v2 }
 0x2b9   : > { %1611 = vpow2.f32 %v1095_v33 }
 0x2ba   : > { %v1608_v44 = vpop.eup %1607 }
 0x2bb   : > { %v1610_v50 = vpop.eup %1609  ;;  %v1192_v35 = vmul.f32 0.6931472, %v1608_v44 }
 0x2bc   : > { %v1236_v18 = vmul.f32 0.6931472, %v1610_v50  ;;  %v1002_v57 = vpop.xlane.xlu1 %1001  ;;  %v1174_v37 = vpop.xlane.xlu0 %1173 }
 0x2bd   : > { %v1253_v51 = vsub.f32 %v2019_v59, %v1192_v35  ;;  %v2152_v48 = vsub.f32 %v2047_v22, %v1002_v57  ;;  %1613 = vlog2.f32 %v1174_v37  ;;  %v2186_v57 = vsub.f32 %v1975_v29, %v2098_v14 }
 0x2be   : > { %v1275_v9 = vsub.f32 %v2022_v60, %v1236_v18  ;;  %v2198_v29 = vsub.f32 %v1959_v21, %v2069_v56 }
 0x2bf   : > { %v1612_v62 = vpop.eup %1611  ;;  %1285 = vst [vmem:[%s2136_s8 + $0x10] sm:$0xff] %v1253_v51  ;;  %v1097_v40 = vmul.f32 1.442695, %v2152_v48 }
 0x2c0   : > { %1307 = vst [vmem:[%s2136_s8 + $0xc0] sm:$0xff] %v1275_v9  ;;  %1159 = vadd.xlane.f32.xlu2 %v1612_v62  ;;  %v1121_v62 = vmul.f32 1.442695, %v2186_v57 }
 0x2c1   : > { %1615 = vpow2.f32 %v1097_v40 }
 0x2c3   : > { %v1614_v23 = vpop.eup %1613  ;;  %v1130_v17 = vpop.xlane.xlu2 %1129 }
 0x2c4   : > { %v1238_v10 = vmul.f32 0.6931472, %v1614_v23  ;;  %1617 = vlog2.f32 %v1130_v17  ;;  %v1176_v11 = vpop.xlane.xlu1 %1175 }
 0x2c5   : > { %1619 = vlog2.f32 %v1176_v11 }
 0x2c6   : > { %v1276_v59 = vsub.f32 %v2031_v55, %v1238_v10 }
 0x2c7   : > { %v1616_v22 = vpop.eup %1615  ;;  %v1132_v8 = vpop.xlane.xlu0 %1131 }
 0x2c8   : > { %1308 = vst [vmem:[%s2136_s8 + $0xc8] sm:$0xff] %v1276_v59  ;;  %1621 = vlog2.f32 %v1132_v8  ;;  %1161 = vadd.xlane.f32.xlu0 %v1616_v22  ;;  %v1117_v59 = vmul.f32 1.442695, %v2198_v29 }
 0x2ca   : > { %v1618_v60 = vpop.eup %1617 }
 0x2cb   : > { %v1620_v15 = vpop.eup %1619  ;;  %v1194_v49 = vmul.f32 0.6931472, %v1618_v60  ;;  %v1004_v52 = vpop.xlane.xlu2 %1003 }
 0x2cc   : > { %v1240_v20 = vmul.f32 0.6931472, %v1620_v15  ;;  %v2161_v41 = vsub.f32 %v2062_v47, %v1004_v52 }
 0x2cd   : > { %v1254_v1 = vsub.f32 %v2042_v61, %v1194_v49  ;;  %v2175_v61 = vsub.f32 %v1967_v25, %v2086_v5 }
 0x2ce   : > { %v1622_v38 = vpop.eup %1621  ;;  %v1277_v55 = vsub.f32 %v2039_v12, %v1240_v20  ;;  %v1099_v28 = vmul.f32 1.442695, %v2161_v41 }
 0x2cf   : > { %1286 = vst [vmem:[%s2136_s8 + $0x18] sm:$0xff] %v1254_v1  ;;  %v1196_v30 = vmul.f32 0.6931472, %v1622_v38  ;;  %v1134_v31 = vpop.xlane.xlu1 %1133  ;;  %v1006_v34 = vpop.xlane.xlu0 %1005  ;;  %v1119_v44 = vmul.f32 1.442695, %v2175_v61 }
 0x2d0   : > { %1309 = vst [vmem:[%s2136_s8 + $0xd0] sm:$0xff] %v1277_v55  ;;  %1623 = vpow2.f32 %v1099_v28  ;;  %v2169_v39 = vsub.f32 %v2067_v16, %v1006_v34 }
 0x2d1   : > { %v1255_v47 = vsub.f32 %v2050_v26, %v1196_v30  ;;  %1625 = vlog2.f32 %v1134_v31 }
 0x2d2   : > { %v1101_v7 = vmul.f32 1.442695, %v2169_v39 }
 0x2d3   : > { %1287 = vst [vmem:[%s2136_s8 + $0x20] sm:$0xff] %v1255_v47  ;;  %v1136_v12 = vpop.xlane.xlu2 %1135 }
 0x2d4   : > { %1627 = vpow2.f32 %v1101_v7 }
 0x2d5   : > { %1629 = vlog2.f32 %v1136_v12 }
 0x2d6   : > { %v1624_v2 = vpop.eup %1623  ;;  %1631 = vpow2.f32 %v1119_v44 }
 0x2d7   : > { %v1626_v33 = vpop.eup %1625  ;;  %v1008_v16 = vpop.xlane.xlu1 %1007  ;;  %1163 = vadd.xlane.f32.xlu1 %v1624_v2 }
 0x2d8   : > { %v1198_v50 = vmul.f32 0.6931472, %v1626_v33  ;;  %v2180_v26 = vsub.f32 %v2083_v3, %v1008_v16 }
 0x2da   : > { %v1628_v35 = vpop.eup %1627  ;;  %v1256_v18 = vsub.f32 %v2055_v36, %v1198_v50  ;;  %v1103_v25 = vmul.f32 1.442695, %v2180_v26 }
 0x2db   : > { %v1630_v5 = vpop.eup %1629  ;;  %1165 = vadd.xlane.f32.xlu2 %v1628_v35  ;;  %v1138_v37 = vpop.xlane.xlu0 %1137 }
 0x2dc   : > { %1288 = vst [vmem:[%s2136_s8 + $0x28] sm:$0xff] %v1256_v18  ;;  %v1200_v51 = vmul.f32 0.6931472, %v1630_v5  ;;  %1633 = vpow2.f32 %v1103_v25  ;;  %v1010_v9 = vpop.xlane.xlu2 %1009  ;;  %v1632_v23 = vpop.eup %1631 }
 0x2dd   : > { %1635 = vlog2.f32 %v1138_v37  ;;  %v2190_v3 = vsub.f32 %v2095_v13, %v1010_v9 }
 0x2de   : > { %v1257_v36 = vsub.f32 %v2059_v46, %v1200_v51 }
 0x2df   : > { %v1105_v40 = vmul.f32 1.442695, %v2190_v3 }
 0x2e0   : > { %1289 = vst [vmem:[%s2136_s8 + $0x30] sm:$0xff] %v1257_v36 }
 0x2e1   : > { %1637 = vpow2.f32 %v1105_v40 }
 0x2e2   : > { %v1634_v14 = vpop.eup %1633  ;;  %1639 = vpow2.f32 %v1121_v62 }
 0x2e3   : > { %v1636_v17 = vpop.eup %1635  ;;  %v1140_v10 = vpop.xlane.xlu1 %1139  ;;  %1167 = vadd.xlane.f32.xlu0 %v1634_v14  ;;  %1183 = vadd.xlane.f32.xlu2 %v1632_v23 }
 0x2e4   : > { %v1180_v13 = vpop.xlane.xlu0 %1179  ;;  %v1202_v46 = vmul.f32 0.6931472, %v1636_v17  ;;  %1641 = vlog2.f32 %v1140_v10  ;;  %v1178_v11 = vpop.xlane.xlu2 %1177 }
 0x2e5   : > { %1643 = vlog2.f32 %v1180_v13 }
 0x2e6   : > { %v1258_v22 = vsub.f32 %v2073_v19, %v1202_v46  ;;  %1645 = vlog2.f32 %v1178_v11 }
 0x2e7   : > { %v1638_v21 = vpop.eup %1637  ;;  %1647 = vpow2.f32 %v1117_v59 }
 0x2e8   : > { %1290 = vst [vmem:[%s2136_s8 + $0x38] sm:$0xff] %v1258_v22  ;;  %1169 = vadd.xlane.f32.xlu1 %v1638_v21  ;;  %v1640_v56 = vpop.eup %1639 }
 0x2ea   : > { %v1642_v8 = vpop.eup %1641 }
 0x2eb   : > { %v1644_v60 = vpop.eup %1643  ;;  %v1204_v15 = vmul.f32 0.6931472, %v1642_v8  ;;  %1185 = vadd.xlane.f32.xlu0 %v1640_v56 }
 0x2ec   : > { %v1646_v49 = vpop.eup %1645  ;;  %v1244_v52 = vmul.f32 0.6931472, %v1644_v60  ;;  %v1142_v20 = vpop.xlane.xlu2 %1141 }
 0x2ed   : > { %v1259_v1 = vsub.f32 %v2090_v6, %v1204_v15  ;;  %v1242_v19 = vmul.f32 0.6931472, %v1646_v49  ;;  %1649 = vlog2.f32 %v1142_v20  ;;  %v1648_v55 = vpop.eup %1647 }
 0x2ee   : > { %v1279_v38 = vsub.f32 %v2077_v63, %v1244_v52 }
 0x2ef   : > { %1291 = vst [vmem:[%s2136_s8 + $0x40] sm:$0xff] %v1259_v1  ;;  %v1278_v28 = vsub.f32 %v2080_v0, %v1242_v19 }
 0x2f0   : > { %1311 = vst [vmem:[%s2136_s8 + $0xe0] sm:$0xff] %v1279_v38  ;;  %1181 = vadd.xlane.f32.xlu1 %v1648_v55 }
 0x2f1   : > { %1310 = vst [vmem:[%s2136_s8 + $0xd8] sm:$0xff] %v1278_v28 }
 0x2f3   : > { %v1650_v30 = vpop.eup %1649  ;;  %v1144_v31 = vpop.xlane.xlu0 %1143 }
 0x2f4   : > { %v1206_v34 = vmul.f32 0.6931472, %v1650_v30  ;;  %1651 = vlog2.f32 %v1144_v31 }
 0x2f6   : > { %v1260_v47 = vsub.f32 %v2101_v27, %v1206_v34 }
 0x2f8   : > { %1292 = vst [vmem:[%s2136_s8 + $0x48] sm:$0xff] %v1260_v47 }
 0x2fa   : > { %v1652_v6 = vpop.eup %1651 }
 0x2fb   : > { %v1208_v7 = vmul.f32 0.6931472, %v1652_v6  ;;  %v1146_v63 = vpop.xlane.xlu1 %1145 }
 0x2fc   : > { %1653 = vlog2.f32 %v1146_v63 }
 0x2fd   : > { %v1261_v12 = vsub.f32 %v2105_v4, %v1208_v7 }
 0x2ff   : > { %1293 = vst [vmem:[%s2136_s8 + $0x50] sm:$0xff] %v1261_v12 }
 0x302   : > { %v1654_v0 = vpop.eup %1653 }
 0x303   : > { %v1210_v2 = vmul.f32 0.6931472, %v1654_v0  ;;  %v1148_v33 = vpop.xlane.xlu2 %1147 }
 0x304   : > { %1655 = vlog2.f32 %v1148_v33 }
 0x305   : > { %v1262_v44 = vsub.f32 %v2109_v32, %v1210_v2 }
 0x307   : > { %1294 = vst [vmem:[%s2136_s8 + $0x58] sm:$0xff] %v1262_v44 }
 0x30a   : > { %v1656_v16 = vpop.eup %1655 }
 0x30b   : > { %v1212_v50 = vmul.f32 0.6931472, %v1656_v16  ;;  %v1150_v27 = vpop.xlane.xlu0 %1149 }
 0x30c   : > { %1657 = vlog2.f32 %v1150_v27 }
 0x30d   : > { %v1263_v35 = vsub.f32 %v2113_v42, %v1212_v50 }
 0x30f   : > { %1295 = vst [vmem:[%s2136_s8 + $0x60] sm:$0xff] %v1263_v35 }
 0x312   : > { %v1658_v18 = vpop.eup %1657 }
 0x313   : > { %v1214_v25 = vmul.f32 0.6931472, %v1658_v18  ;;  %v1152_v4 = vpop.xlane.xlu1 %1151 }
 0x314   : > { %1659 = vlog2.f32 %v1152_v4 }
 0x315   : > { %v1264_v5 = vsub.f32 %v2117_v53, %v1214_v25 }
 0x317   : > { %1296 = vst [vmem:[%s2136_s8 + $0x68] sm:$0xff] %v1264_v5 }
 0x31a   : > { %v1660_v37 = vpop.eup %1659 }
 0x31b   : > { %v1216_v51 = vmul.f32 0.6931472, %v1660_v37  ;;  %v1154_v32 = vpop.xlane.xlu2 %1153 }
 0x31c   : > { %1661 = vlog2.f32 %v1154_v32 }
 0x31d   : > { %v1265_v9 = vsub.f32 %v2121_v58, %v1216_v51 }
 0x31f   : > { %1297 = vst [vmem:[%s2136_s8 + $0x70] sm:$0xff] %v1265_v9 }
 0x322   : > { %v1662_v36 = vpop.eup %1661 }
 0x323   : > { %v1218_v62 = vmul.f32 0.6931472, %v1662_v36  ;;  %v1156_v42 = vpop.xlane.xlu0 %1155 }
 0x324   : > { %1663 = vlog2.f32 %v1156_v42 }
 0x325   : > { %v1266_v40 = vsub.f32 %v2125_v54, %v1218_v62 }
 0x327   : > { %1298 = vst [vmem:[%s2136_s8 + $0x78] sm:$0xff] %v1266_v40 }
 0x32a   : > { %v1664_v23 = vpop.eup %1663 }
 0x32b   : > { %v1220_v14 = vmul.f32 0.6931472, %v1664_v23  ;;  %v1158_v53 = vpop.xlane.xlu1 %1157 }
 0x32c   : > { %1665 = vlog2.f32 %v1158_v53 }
 0x32d   : > { %v1267_v17 = vsub.f32 %v2129_v43, %v1220_v14 }
 0x32f   : > { %1299 = vst [vmem:[%s2136_s8 + $0x80] sm:$0xff] %v1267_v17 }
 0x332   : > { %v1666_v10 = vpop.eup %1665 }
 0x333   : > { %v1222_v58 = vmul.f32 0.6931472, %v1666_v10  ;;  %v1160_v13 = vpop.xlane.xlu2 %1159 }
 0x334   : > { %1667 = vlog2.f32 %v1160_v13 }
 0x335   : > { %v1268_v46 = vsub.f32 %v2140_v24, %v1222_v58 }
 0x337   : > { %1300 = vst [vmem:[%s2136_s8 + $0x88] sm:$0xff] %v1268_v46 }
 0x33a   : > { %v1668_v11 = vpop.eup %1667 }
 0x33b   : > { %v1224_v59 = vmul.f32 0.6931472, %v1668_v11  ;;  %v1162_v54 = vpop.xlane.xlu0 %1161 }
 0x33c   : > { %1669 = vlog2.f32 %v1162_v54 }
 0x33d   : > { %v1269_v22 = vsub.f32 %v2146_v45, %v1224_v59 }
 0x33f   : > { %1301 = vst [vmem:[%s2136_s8 + $0x90] sm:$0xff] %v1269_v22 }
 0x342   : > { %v1670_v21 = vpop.eup %1669 }
 0x343   : > { %v1226_v56 = vmul.f32 0.6931472, %v1670_v21 }
 0x345   : > { %v1270_v43 = vsub.f32 %v2152_v48, %v1226_v56 }
 0x347   : > { %1302 = vst [vmem:[%s2136_s8 + $0x98] sm:$0xff] %v1270_v43 }
 0x34a   : > { %v1164_v8 = vpop.xlane.xlu1 %1163 }
 0x34b   : > { %1671 = vlog2.f32 %v1164_v8 }
 0x34e   : > { %v1166_v60 = vpop.xlane.xlu2 %1165 }
 0x34f   : > { %1673 = vlog2.f32 %v1166_v60 }
 0x351   : > { %v1672_v24 = vpop.eup %1671 }
 0x352   : > { %v1228_v15 = vmul.f32 0.6931472, %v1672_v24 }
 0x354   : > { %v1271_v49 = vsub.f32 %v2161_v41, %v1228_v15 }
 0x355   : > { %v1674_v52 = vpop.eup %1673 }
 0x356   : > { %1303 = vst [vmem:[%s2136_s8 + $0xa0] sm:$0xff] %v1271_v49  ;;  %v1230_v20 = vmul.f32 0.6931472, %v1674_v52  ;;  %v1184_v1 = vpop.xlane.xlu2 %1183  ;;  %v1168_v45 = vpop.xlane.xlu0 %1167 }
 0x357   : > { %1675 = vlog2.f32 %v1184_v1 }
 0x358   : > { %v1272_v48 = vsub.f32 %v2169_v39, %v1230_v20  ;;  %1677 = vlog2.f32 %v1168_v45 }
 0x35a   : > { %1304 = vst [vmem:[%s2136_s8 + $0xa8] sm:$0xff] %v1272_v48 }
 0x35b   : > { %v1170_v19 = vpop.xlane.xlu1 %1169 }
 0x35c   : > { %1679 = vlog2.f32 %v1170_v19 }
 0x35d   : > { %v1676_v38 = vpop.eup %1675 }
 0x35e   : > { %v1678_v55 = vpop.eup %1677  ;;  %v1248_v28 = vmul.f32 0.6931472, %v1676_v38  ;;  %v1186_v30 = vpop.xlane.xlu0 %1185 }
 0x35f   : > { %v1232_v41 = vmul.f32 0.6931472, %v1678_v55  ;;  %1681 = vlog2.f32 %v1186_v30 }
 0x360   : > { %v1281_v31 = vsub.f32 %v2175_v61, %v1248_v28 }
 0x361   : > { %v1273_v34 = vsub.f32 %v2180_v26, %v1232_v41 }
 0x362   : > { %v1680_v47 = vpop.eup %1679  ;;  %1313 = vst [vmem:[%s2136_s8 + $0xf0] sm:$0xff] %v1281_v31 }
 0x363   : > { %1305 = vst [vmem:[%s2136_s8 + $0xb0] sm:$0xff] %v1273_v34  ;;  %v1234_v39 = vmul.f32 0.6931472, %v1680_v47  ;;  %v1182_v6 = vpop.xlane.xlu1 %1181 }
 0x364   : > { %1683 = vlog2.f32 %v1182_v6 }
 0x365   : > { %v1682_v7 = vpop.eup %1681  ;;  %v1274_v63 = vsub.f32 %v2190_v3, %v1234_v39 }
 0x366   : > { %v1250_v12 = vmul.f32 0.6931472, %v1682_v7 }
 0x367   : > { %1306 = vst [vmem:[%s2136_s8 + $0xb8] sm:$0xff] %v1274_v63 }
 0x368   : > { %v1282_v0 = vsub.f32 %v2186_v57, %v1250_v12 }
 0x36a   : > { %v1684_v2 = vpop.eup %1683  ;;  %1314 = vst [vmem:[%s2136_s8 + $0xf8] sm:$0xff] %v1282_v0 }
 0x36b   : > { %v1246_v33 = vmul.f32 0.6931472, %v1684_v2 }
 0x36d   : > { %v1280_v61 = vsub.f32 %v2198_v29, %v1246_v33 }
 0x36f   : > { %1312 = vst [vmem:[%s2136_s8 + $0xe8] sm:$0xff] %v1280_v61 }
 0x370 PF: > { %s17_s24 = sadd.s32 1, %s1691_s24  }
 0x371   : > { %p14_p4 = scmp.ge.s32.totalorder %s17_s24, 4  }
 0x373   :  { %16 = sbr.rel (!%p14_p4) target bundleno = 1 (0x1), region = 78 }

</bundles_post_ra>
